<compile_context>
chip_gen: v6e
topology: v6e:2x2x1
jax: 0.10.0
libtpu: 0.0.40
codegen_flags: <defaults>
</compile_context>

<pallas_src>
import functools

import jax
import jax.numpy as jnp
from jax.experimental import pallas as pl
from jax.experimental.pallas import tpu as pltpu


def _round_up(x, m):
    return ((x + m - 1) // m) * m


def _cdiv(a, b):
    return (a + b - 1) // b


def _choose_batch_tile(B, tb_max=1024):
    """Batch tile: multiple of 8 sublanes (or the full ragged extent), and at
    least two grid steps when possible so v7x can shard across both TCs."""
    SUB = 8
    if B < 2 * SUB:
        # Tiny batch: one block spanning the full (possibly ragged) extent.
        # Legal because a block dim equal to the full array dim is allowed.
        return B
    tb = min((B // SUB) * SUB, tb_max)      # multiple of 8, <= B
    if tb >= B:                             # would leave a single grid step
        tb = min(_round_up((B + 1) // 2, SUB), (B // SUB) * SUB)
    return tb


def mlp_kernel(x_ref, w1_ref, b1_ref, w2_ref, b2_ref, o_ref):
    # x_ref : [tb, D ]  f32   (batch tile, streamed; dominant HBM stream)
    # w1_ref: [D,  H ]  bf16  (VMEM-resident across the grid)
    # b1_ref: [1,  H ]  f32
    # w2_ref: [H,  Cp]  bf16
    # b2_ref: [1,  Cp]  f32
    # o_ref : [tb, Cp]  f32   (lane-dense: Cp is a multiple of 128)
    x_bf = x_ref[...].astype(jnp.bfloat16)              # f32 -> bf16 in-kernel
    h = jnp.dot(x_bf, w1_ref[...], preferred_element_type=jnp.float32)
    h = jnp.tanh(h + b1_ref[...])                        # f32 VPU add + EUP tanh
    out = jnp.dot(h.astype(jnp.bfloat16), w2_ref[...],
                  preferred_element_type=jnp.float32)
    o_ref[...] = (out + b2_ref[...]).astype(o_ref.dtype)


def prepare_params(w1, b1, w2, b2):
    """One-time weight/bias pad + bf16 cast (hoisted out of the per-call path).

    w1: [D, H] f32, b1: [H] f32, w2: [H, C] f32, b2: [C] f32.
    """
    D, H = w1.shape
    C = w2.shape[1]
    Cp = _round_up(C, 128)                                # lane-dense output dim
    w1_p = w1.astype(jnp.bfloat16)                        # [D, H]   (no K pad)
    b1_p = b1.reshape(1, H).astype(jnp.float32)           # [1, H]
    w2_p = jnp.zeros((H, Cp), jnp.bfloat16).at[:, :C].set(w2.astype(jnp.bfloat16))
    b2_p = jnp.zeros((1, Cp), jnp.float32).at[:, :C].set(
        b2.reshape(1, -1).astype(jnp.float32))
    return w1_p, b1_p, w2_p, b2_p


@functools.partial(jax.jit, static_argnames=("num_classes", "tb_max"))
def mlp_forward(x_nchw, w1_p, b1_p, w2_p, b2_p, *, num_classes, tb_max=1024):
    """x_nchw: [B, C, H, W] f32; params from prepare_params().

    Returns [B, num_classes] f32. Matmuls run in bf16 with f32 accumulation.
    """
    B = x_nchw.shape[0]
    x = x_nchw.reshape(B, -1).astype(jnp.float32)         # torch.flatten(1)
    D = x.shape[1]
    H = w1_p.shape[1]
    Cp = w2_p.shape[1]

    tb = _choose_batch_tile(B, tb_max)
    grid_b = _cdiv(B, tb)

    flops = 2 * B * (D * H + H * Cp)
    transcendentals = B * H
    bytes_accessed = (x.size * 4 + w1_p.size * 2 + w2_p.size * 2
                      + b1_p.size * 4 + b2_p.size * 4 + B * Cp * 4)

    out_pad = pl.pallas_call(
        mlp_kernel,
        out_shape=jax.ShapeDtypeStruct((B, Cp), jnp.float32),
        grid_spec=pltpu.PrefetchScalarGridSpec(
            num_scalar_prefetch=0,
            grid=(grid_b,),
            in_specs=[
                pl.BlockSpec((tb, D), lambda i: (i, 0)),   # x : batch-tiled
                pl.BlockSpec((D, H), lambda i: (0, 0)),    # w1: resident
                pl.BlockSpec((1, H), lambda i: (0, 0)),    # b1: resident
                pl.BlockSpec((H, Cp), lambda i: (0, 0)),   # w2: resident
                pl.BlockSpec((1, Cp), lambda i: (0, 0)),   # b2: resident
            ],
            out_specs=pl.BlockSpec((tb, Cp), lambda i: (i, 0)),
        ),
        compiler_params=pltpu.CompilerParams(
            dimension_semantics=("parallel",)),
        cost_estimate=pl.CostEstimate(
            flops=flops,
            transcendentals=transcendentals,
            bytes_accessed=bytes_accessed),
    )(x, w1_p, b1_p, w2_p, b2_p)

    return out_pad[:, :num_classes]


def init_params(key, in_features, hidden=256, num_classes=10):
    """Deterministic init mimicking nn.Linear's uniform(-1/sqrt(fan_in), +)."""
    k1, k2, k3, k4 = jax.random.split(key, 4)
    lim1 = 1.0 / jnp.sqrt(in_features)
    lim2 = 1.0 / jnp.sqrt(hidden)
    w1 = jax.random.uniform(k1, (in_features, hidden), jnp.float32, -lim1, lim1)
    b1 = jax.random.uniform(k2, (hidden,), jnp.float32, -lim1, lim1)
    w2 = jax.random.uniform(k3, (hidden, num_classes), jnp.float32, -lim2, lim2)
    b2 = jax.random.uniform(k4, (num_classes,), jnp.float32, -lim2, lim2)
    return w1, b1, w2, b2


if __name__ == "__main__":
    key = jax.random.PRNGKey(0)
    kx, kp = jax.random.split(key)

    # in_shape == 1 branch of the PyTorch module -> 784 features (MNIST-like).
    B, C, H, W = 2, 1, 28, 28
    in_features = C * H * W                     # 784
    num_classes = 10

    x = jax.random.normal(kx, (B, C, H, W), jnp.float32)
    w1, b1, w2, b2 = init_params(kp, in_features, 256, num_classes)

    # Weights are padded/cast ONCE and reused across calls.
    params = prepare_params(w1, b1, w2, b2)

    out = mlp_forward(x, *params, num_classes=num_classes)
    out = jax.block_until_ready(out)
    assert out.shape == (B, num_classes)

    # Reference that mirrors the kernel's numerics (bf16 operands, f32 accum).
    xb = x.reshape(B, -1).astype(jnp.bfloat16)
    h_ref = jnp.tanh(jnp.dot(xb, w1.astype(jnp.bfloat16),
                             preferred_element_type=jnp.float32) + b1)
    ref = jnp.dot(h_ref.astype(jnp.bfloat16), w2.astype(jnp.bfloat16),
                  preferred_element_type=jnp.float32) + b2
    assert jnp.allclose(out, ref, atol=5e-3, rtol=5e-3)

    # Looser sanity check against the pure-f32 math of the PyTorch module.
    ref_f32 = jnp.tanh(x.reshape(B, -1) @ w1 + b1) @ w2 + b2
    assert jnp.allclose(out, ref_f32, atol=5e-2, rtol=5e-2)

    print("KERNEL_OK")
</pallas_src>

<mosaic_0001>
module attributes {stable_mosaic.version = 11 : i64} {
  func.func @mlp_kernel(%arg0: i32, %arg1: memref<2x784xf32, #tpu.memory_space<vmem>>, %arg2: memref<784x256xbf16, #tpu.memory_space<vmem>>, %arg3: memref<1x256xf32, #tpu.memory_space<vmem>>, %arg4: memref<256x128xbf16, #tpu.memory_space<vmem>>, %arg5: memref<1x128xf32, #tpu.memory_space<vmem>>, %arg6: memref<2x128xf32, #tpu.memory_space<vmem>>) attributes {dimension_semantics = [#tpu.dimension_semantics<parallel>], iteration_bounds = array<i64: 1>, scalar_prefetch = 0 : i64, scratch_operands = 0 : i64, tpu.core_type = #tpu.core_type<tc>, window_params = [{transform_indices = @transform_0, window_bounds = array<i64: 2, 784>}, {pipeline_mode = #tpu.pipeline_mode<synchronous>, transform_indices = @transform_1, window_bounds = array<i64: 784, 256>}, {pipeline_mode = #tpu.pipeline_mode<synchronous>, transform_indices = @transform_2, window_bounds = array<i64: 1, 256>}, {pipeline_mode = #tpu.pipeline_mode<synchronous>, transform_indices = @transform_3, window_bounds = array<i64: 256, 128>}, {pipeline_mode = #tpu.pipeline_mode<synchronous>, transform_indices = @transform_4, window_bounds = array<i64: 1, 128>}, {transform_indices = @transform_5, window_bounds = array<i64: 2, 128>}]} {
    %c0 = arith.constant 0 : index
    %c0_0 = arith.constant 0 : index
    %0 = vector.load %arg1[%c0, %c0_0] : memref<2x784xf32, #tpu.memory_space<vmem>>, vector<2x784xf32>
    %1 = arith.truncf %0 : vector<2x784xf32> to vector<2x784xbf16>
    %c0_1 = arith.constant 0 : index
    %c0_2 = arith.constant 0 : index
    %2 = vector.load %arg2[%c0_1, %c0_2] : memref<784x256xbf16, #tpu.memory_space<vmem>>, vector<784x256xbf16>
    %cst = arith.constant dense<0.000000e+00> : vector<2x256xf32>
    %3 = tpu.matmul %1, %2, %cst {dimension_numbers = #tpu.dot_dimension_numbers<[1], [0], [0], [1], [0, 0, 1, 1], [], []>} : vector<2x784xbf16>, vector<784x256xbf16>, vector<2x256xf32> -> vector<2x256xf32>
    %c0_3 = arith.constant 0 : index
    %c0_4 = arith.constant 0 : index
    %4 = vector.load %arg3[%c0_3, %c0_4] : memref<1x256xf32, #tpu.memory_space<vmem>>, vector<1x256xf32>
    %5 = vector.broadcast %4 : vector<1x256xf32> to vector<2x256xf32>
    %6 = arith.addf %3, %5 : vector<2x256xf32>
    %7 = math.tanh %6 : vector<2x256xf32>
    %8 = arith.truncf %7 : vector<2x256xf32> to vector<2x256xbf16>
    %c0_5 = arith.constant 0 : index
    %c0_6 = arith.constant 0 : index
    %9 = vector.load %arg4[%c0_5, %c0_6] : memref<256x128xbf16, #tpu.memory_space<vmem>>, vector<256x128xbf16>
    %cst_7 = arith.constant dense<0.000000e+00> : vector<2x128xf32>
    %10 = tpu.matmul %8, %9, %cst_7 {dimension_numbers = #tpu.dot_dimension_numbers<[1], [0], [0], [1], [0, 0, 1, 1], [], []>} : vector<2x256xbf16>, vector<256x128xbf16>, vector<2x128xf32> -> vector<2x128xf32>
    %c0_8 = arith.constant 0 : index
    %c0_9 = arith.constant 0 : index
    %11 = vector.load %arg5[%c0_8, %c0_9] : memref<1x128xf32, #tpu.memory_space<vmem>>, vector<1x128xf32>
    %12 = vector.broadcast %11 : vector<1x128xf32> to vector<2x128xf32>
    %13 = arith.addf %10, %12 : vector<2x128xf32>
    %c0_10 = arith.constant 0 : index
    %c0_11 = arith.constant 0 : index
    %14 = vector.load %arg6[%c0_10, %c0_11] : memref<2x128xf32, #tpu.memory_space<vmem>>, vector<2x128xf32>
    tpu.vector_store %arg6[%c0_10, %c0_11], %13 {strides = array<i32>} : memref<2x128xf32, #tpu.memory_space<vmem>>, vector<2x128xf32>,
    return
  }
  func.func @transform_0(%arg0: i32) -> (i32, i32) {
    %c0_i32 = arith.constant 0 : i32
    %c0_i32_0 = arith.constant 0 : i32
    return %arg0, %c0_i32 : i32, i32
  }
  func.func @transform_1(%arg0: i32) -> (i32, i32) {
    %c0_i32 = arith.constant 0 : i32
    %c0_i32_0 = arith.constant 0 : i32
    %c0_i32_1 = arith.constant 0 : i32
    return %c0_i32, %c0_i32_0 : i32, i32
  }
  func.func @transform_2(%arg0: i32) -> (i32, i32) {
    %c0_i32 = arith.constant 0 : i32
    %c0_i32_0 = arith.constant 0 : i32
    %c0_i32_1 = arith.constant 0 : i32
    return %c0_i32, %c0_i32_0 : i32, i32
  }
  func.func @transform_3(%arg0: i32) -> (i32, i32) {
    %c0_i32 = arith.constant 0 : i32
    %c0_i32_0 = arith.constant 0 : i32
    %c0_i32_1 = arith.constant 0 : i32
    return %c0_i32, %c0_i32_0 : i32, i32
  }
  func.func @transform_4(%arg0: i32) -> (i32, i32) {
    %c0_i32 = arith.constant 0 : i32
    %c0_i32_0 = arith.constant 0 : i32
    %c0_i32_1 = arith.constant 0 : i32
    return %c0_i32, %c0_i32_0 : i32, i32
  }
  func.func @transform_5(%arg0: i32) -> (i32, i32) {
    %c0_i32 = arith.constant 0 : i32
    %c0_i32_0 = arith.constant 0 : i32
    return %arg0, %c0_i32 : i32, i32
  }
}

</mosaic_0001>

<bundles_post_ra>
// kernel: mlp_forward.1
= control target key start
LH: loop header
LB: loop body
LE: loop exit
PB: predicated region body
PF: predicated region fallthrough
CT: control target
= control target key end

     0   :  { %10 = vsyncpa [#allocation3], 0  ;;  %s1527_s0 = inlined_call_operand.vmem [shape: f32[2,784], index: 0, kind: input, shape index: {}]   ;;  %s1528_s1 = inlined_call_operand.hbm [shape: bf16[784,256], index: 1, kind: input, shape index: {}]   ;;  %s1529_s2 = inlined_call_operand.vmem [shape: f32[1,256], index: 2, kind: input, shape index: {}]   ;;  %s1530_s3 = inlined_call_operand.vmem [shape: bf16[256,128], index: 3, kind: input, shape index: {}]   ;;  %s1531_s4 = inlined_call_operand.vmem [shape: f32[1,128], index: 4, kind: input, shape index: {}]   ;;  %s1532_s5 = inlined_call_operand.hbm [shape: f32[2,128], index: 5, kind: output, shape index: {}]  }
   0x1   :  { %11 = vsyncpa [#allocation4], 0  ;;  %s1407_s18 = smov [#allocation2]  }
   0x2   :  { %s19_s19 = sshll.u32 %s1407_s18, 4  ;;  %s20_s19 = int_to_ptr.vmem [resolvable:$true] %s19_s19 }
   0x3   :  { %s1371_s20 = scalar_lea.vmem %s20_s19, 12544  ;;  %p1376_p1 = scmp.lt.s32.totalorder %s20_s19, %s20_s19 }
   0x4   :  { %p1372_p0 = scmp.ne.s32.totalorder %s20_s19, %s1371_s20  ;;  %p1377_p2 = scmp.lt.s32.totalorder %s1371_s20, %s1371_s20 }
   0x6   :  { %p1378_p3 = por %p1377_p2, %p1376_p1 }
   0x8   :  { %p1379_p4 = pnand %p1378_p3, %p1372_p0 }
   0xa   :  { %1382 = shalt.err (!%p1379_p4)
}
   0xb   :  { %s1408_s21 = smov 128   ;;  %s1409_s22 = smov 8  }
   0xc   :  { %25 = dma.hbm_to_vmem [thread:$0]  %s1528_s1, 12544, %s20_s19, [#allocation3], %s1408_s21, %s1408_s21, %s1409_s22  }
   0xd   :  { %1403 = dma.done.wait [#allocation3], 12544  }
   0xe   :  { %1404 = vsyncadd [#allocation3], 4294954752  ;;  %v1194_v0 = vld [vmem:[#allocation2 + $0x74] ss:$8 sps:$4 sm:$0xff]   ;;  %v1196_v1 = vld [vmem:[#allocation2 + $0x70] ss:$8 sps:$4 sm:$0xff]   ;;  %v44_v37 = vlaneseq }
   0xf   :  { %691 = vmatprep.subr.bf16.mxu0 %v1194_v0  ;;  %v1197_v2 = vld [vmem:[#allocation2 + $0x174] ss:$8 sps:$4 sm:$0xff]   ;;  %v1199_v3 = vld [vmem:[#allocation2 + $0x170] ss:$8 sps:$4 sm:$0xff]   ;;  %v1200_v4 = vld [vmem:[#allocation2 + $0x64] ss:$8 sps:$4 sm:$0xff]  }
  0x10   :  { %692 = vmatpush1.bf16.msra.mxu0 %v1196_v1  ;;  %v1202_v5 = vld [vmem:[#allocation2 + $0x60] ss:$8 sps:$4 sm:$0xff]   ;;  %732 = vmatprep.subr.bf16.mxu1 %v1197_v2  ;;  %v1203_v6 = vld [vmem:[#allocation2 + $0x164] ss:$8 sps:$4 sm:$0xff]   ;;  %v1206_v8 = vld [vmem:[#allocation2 + $0x54] ss:$8 sps:$4 sm:$0xff]  }
  0x11   :  { %733 = vmatpush1.bf16.msra.mxu1 %v1199_v3  ;;  %693 = vmatprep.subr.bf16.mxu0 %v1200_v4  ;;  %v1205_v7 = vld [vmem:[#allocation2 + $0x160] ss:$8 sps:$4 sm:$0xff]   ;;  %v1208_v9 = vld [vmem:[#allocation2 + $0x50] ss:$8 sps:$4 sm:$0xff]   ;;  %v1209_v10 = vld [vmem:[#allocation2 + $0x154] ss:$8 sps:$4 sm:$0xff]  }
  0x12   :  { %734 = vmatprep.subr.bf16.mxu1 %v1203_v6  ;;  %v1212_v11 = vld [vmem:[#allocation2 + $0x44] ss:$8 sps:$4 sm:$0xff]   ;;  %v1211_v12 = vld [vmem:[#allocation2 + $0x150] ss:$8 sps:$4 sm:$0xff]   ;;  %v1214_v14 = vld [vmem:[#allocation2 + $0x40] ss:$8 sps:$4 sm:$0xff]  }
  0x13   :  { %v1215_v13 = vld [vmem:[#allocation2 + $0x144] ss:$8 sps:$4 sm:$0xff]   ;;  %v1218_v15 = vld [vmem:[#allocation2 + $0x34] ss:$8 sps:$4 sm:$0xff]   ;;  %v1217_v16 = vld [vmem:[#allocation2 + $0x140] ss:$8 sps:$4 sm:$0xff]  }
  0x14   :  { %694 = vmatpush1.bf16.msra.mxu0 %v1202_v5  ;;  %v1221_v17 = vld [vmem:[#allocation2 + $0x134] ss:$8 sps:$4 sm:$0xff]   ;;  %v1220_v18 = vld [vmem:[#allocation2 + $0x30] ss:$8 sps:$4 sm:$0xff]   ;;  %v1224_v19 = vld [vmem:[#allocation2 + $0x24] ss:$8 sps:$4 sm:$0xff]  }
  0x15   :  { %695 = vmatprep.subr.bf16.mxu0 %v1206_v8  ;;  %735 = vmatpush1.bf16.msra.mxu1 %v1205_v7  ;;  %v1223_v20 = vld [vmem:[#allocation2 + $0x130] ss:$8 sps:$4 sm:$0xff]   ;;  %v1227_v21 = vld [vmem:[#allocation2 + $0x124] ss:$8 sps:$4 sm:$0xff]   ;;  %v1226_v22 = vld [vmem:[#allocation2 + $0x20] ss:$8 sps:$4 sm:$0xff]  }
  0x16   :  { %736 = vmatprep.subr.bf16.mxu1 %v1209_v10  ;;  %v1230_v23 = vld [vmem:[#allocation2 + $0x14] ss:$8 sps:$4 sm:$0xff]   ;;  %v1229_v24 = vld [vmem:[#allocation2 + $0x120] ss:$8 sps:$4 sm:$0xff]   ;;  %v1232_v26 = vld [vmem:[#allocation2 + $0x10] ss:$8 sps:$4 sm:$0xff]  }
  0x17   :  { %v1233_v25 = vld [vmem:[#allocation2 + $0x114] ss:$8 sps:$4 sm:$0xff]   ;;  %v1236_v27 = vld [vmem:[#allocation2 + $0x4] ss:$8 sps:$4 sm:$0xff]   ;;  %v1235_v28 = vld [vmem:[#allocation2 + $0x110] ss:$8 sps:$4 sm:$0xff]  }
  0x18   :  { %696 = vmatpush1.bf16.msra.mxu0 %v1208_v9  ;;  %v1239_v29 = vld [vmem:[#allocation2 + $0x104] ss:$8 sps:$4 sm:$0xff]   ;;  %v1238_v30 = vld [vmem:[#allocation2] ss:$8 sps:$4 sm:$0xff]   ;;  %v1242_v31 = vld [vmem:[#allocation2 + $0xf4] ss:$8 sps:$4 sm:$0xff]  }
  0x19   :  { %697 = vmatprep.subr.bf16.mxu0 %v1212_v11  ;;  %737 = vmatpush1.bf16.msra.mxu1 %v1211_v12  ;;  %v1241_v32 = vld [vmem:[#allocation2 + $0x100] ss:$8 sps:$4 sm:$0xff]   ;;  %v1245_v33 = vld [vmem:[#allocation2 + $0x1f4] ss:$8 sps:$4 sm:$0xff]   ;;  %v1244_v34 = vld [vmem:[#allocation2 + $0xf0] ss:$8 sps:$4 sm:$0xff]  }
  0x1a   :  { %738 = vmatprep.subr.bf16.mxu1 %v1215_v13  ;;  %v1410_v35 = vmov 1983009808   ;;  %v1248_v38 = vld [vmem:[#allocation2 + $0xe4] ss:$8 sps:$4 sm:$0xff]   ;;  %v1247_v39 = vld [vmem:[#allocation2 + $0x1f0] ss:$8 sps:$4 sm:$0xff]  }
  0x1b   :  { %v42_v36 = vunpack.c.l.s4 %v1410_v35  ;;  %v1251_v40 = vld [vmem:[#allocation2 + $0x1e4] ss:$8 sps:$4 sm:$0xff]   ;;  %v1250_v41 = vld [vmem:[#allocation2 + $0xe0] ss:$8 sps:$4 sm:$0xff]   ;;  %v1446_v43 = vshrl.u32 %v44_v37, 7  ;;  %vm687_vm0 = vcmask 130048  }
  0x1c   :  { %698 = vmatpush1.bf16.msra.mxu0 %v1214_v14  ;;  %v1254_v44 = vld [vmem:[#allocation2 + $0xd4] ss:$8 sps:$4 sm:$0xff]   ;;  %v1253_v45 = vld [vmem:[#allocation2 + $0x1e0] ss:$8 sps:$4 sm:$0xff]   ;;  %v1256_v47 = vld [vmem:[#allocation2 + $0xd0] ss:$8 sps:$4 sm:$0xff]  }
  0x1d   :  { %699 = vmatprep.subr.bf16.mxu0 %v1218_v15  ;;  %739 = vmatpush1.bf16.msra.mxu1 %v1217_v16  ;;  %v43_v42 = vunpack.c.0.s8 %v42_v36  ;;  %v1257_v46 = vld [vmem:[#allocation2 + $0x1d4] ss:$8 sps:$4 sm:$0xff]   ;;  %v1260_v49 = vld [vmem:[#allocation2 + $0xc4] ss:$8 sps:$4 sm:$0xff]   ;;  %v1259_v50 = vld [vmem:[#allocation2 + $0x1d0] ss:$8 sps:$4 sm:$0xff]  }
  0x1e   :  { %740 = vmatprep.subr.bf16.mxu1 %v1221_v17  ;;  %v1263_v51 = vld [vmem:[#allocation2 + $0x1c4] ss:$8 sps:$4 sm:$0xff]   ;;  %v1262_v53 = vld [vmem:[#allocation2 + $0xc0] ss:$8 sps:$4 sm:$0xff]   ;;  %v1266_v56 = vld [vmem:[#allocation2 + $0xb4] ss:$8 sps:$4 sm:$0xff]  }
  0x1f   :  { %v1449_v48 = vsub.s32 %v43_v42, %v1446_v43  ;;  %v36_v52 = vld [vmem:[%s1527_s0] sm:$0xff]  ;;  %v1269_v60 = vld [vmem:[#allocation2 + $0x1b4] ss:$8 sps:$4 sm:$0xff]   ;;  %v1268_v61 = vld [vmem:[#allocation2 + $0xb0] ss:$8 sps:$4 sm:$0xff]   ;;  %s1412_s9 = smov [#allocation5]  }
  0x20   :  { %700 = vmatpush1.bf16.msra.mxu0 %v1220_v18  ;;  %v40_v55 = vcombine.high %v36_v52, %v36_v52  ;;  %v1265_v57 = vld [vmem:[#allocation2 + $0x1c0] ss:$8 sps:$4 sm:$0xff]   ;;  %v1272_v0 = vld [vmem:[#allocation2 + $0xa4] ss:$8 sps:$4 sm:$0xff]   ;;  %v1271_v1 = vld [vmem:[#allocation2 + $0x1b0] ss:$8 sps:$4 sm:$0xff]  }
  0x21   :  { %701 = vmatprep.subr.bf16.mxu0 %v1224_v19  ;;  %741 = vmatpush1.bf16.msra.mxu1 %v1223_v20  ;;  %v47_v54 = vrot.slane %v36_v52, %v1449_v48  ;;  %v1275_v3 = vld [vmem:[#allocation2 + $0x1a4] ss:$8 sps:$4 sm:$0xff]   ;;  %v1274_v4 = vld [vmem:[#allocation2 + $0xa0] ss:$8 sps:$4 sm:$0xff]   ;;  %v1278_v5 = vld [vmem:[#allocation2 + $0x94] ss:$8 sps:$4 sm:$0xff]  }
  0x22   :  { %742 = vmatprep.subr.bf16.mxu1 %v1227_v21  ;;  %v54_v59 = vrot.slane %v40_v55, %v1449_v48  ;;  %v1277_v6 = vld [vmem:[#allocation2 + $0x1a0] ss:$8 sps:$4 sm:$0xff]   ;;  %v1281_v7 = vld [vmem:[#allocation2 + $0x194] ss:$8 sps:$4 sm:$0xff]   ;;  %v1280_v8 = vld [vmem:[#allocation2 + $0x90] ss:$8 sps:$4 sm:$0xff]  }
  0x23   :  { %v55_v58 = vcombine.high %v47_v54, %v47_v54  ;;  %v1284_v9 = vld [vmem:[#allocation2 + $0x84] ss:$8 sps:$4 sm:$0xff]   ;;  %v1283_v10 = vld [vmem:[#allocation2 + $0x190] ss:$8 sps:$4 sm:$0xff]   ;;  %v1286_v12 = vld [vmem:[#allocation2 + $0x80] ss:$8 sps:$4 sm:$0xff]   ;;  %v80_v15 = vpack.c.bf16 %v47_v54, %v47_v54 }
  0x24   :  { %702 = vmatpush1.bf16.msra.mxu0 %v1226_v22  ;;  %v56_v63 = vcombine.high %v54_v59, %v54_v59  ;;  %v1287_v11 = vld [vmem:[#allocation2 + $0x184] ss:$8 sps:$4 sm:$0xff]   ;;  %v1292_v13 = vld [vmem:[#allocation2 + $0x274] ss:$8 sps:$4 sm:$0xff]   ;;  %v1289_v14 = vld [vmem:[#allocation2 + $0x180] ss:$8 sps:$4 sm:$0xff]   ;;  %v82_v18 = vpack.c.bf16 %v54_v59, %v54_v59 }
  0x25   :  { %703 = vmatprep.subr.bf16.mxu0 %v1230_v23  ;;  %743 = vmatpush1.bf16.msra.mxu1 %v1229_v24  ;;  %v81_v62 = vpack.c.bf16 %v55_v58, %v55_v58  ;;  %v1290_v16 = vld [vmem:[#allocation2 + $0x270] ss:$8 sps:$4 sm:$0xff]   ;;  %v1296_v17 = vld [vmem:[#allocation2 + $0x264] ss:$8 sps:$4 sm:$0xff]   ;;  %v1294_v20 = vld [vmem:[#allocation2 + $0x260] ss:$8 sps:$4 sm:$0xff]  }
  0x26   :  { %744 = vmatprep.subr.bf16.mxu1 %v1233_v25  ;;  %v83_v2 = vpack.c.bf16 %v56_v63, %v56_v63  ;;  %v1338_v19 = vld [vmem:[#allocation2 + $0x304] ss:$8 sps:$4 sm:$0xff]   ;;  %v1336_v21 = vld [vmem:[#allocation2 + $0x300] ss:$8 sps:$4 sm:$0xff]   ;;  %v1299_v23 = vld [vmem:[#allocation2 + $0x254] ss:$8 sps:$4 sm:$0xff]  }
  0x27   :  { %723 = vmatprep.mubr.bf16.mxu0 %v81_v62  ;;  %v37_v22 = vld [vmem:[%s1527_s0 + $0x8] sm:$0x3f]  ;;  %v1303_v35 = vld [vmem:[#allocation2 + $0x230] ss:$8 sps:$4 sm:$0xff]   ;;  %v1317_v42 = vld [vmem:[#allocation2 + $0x2f4] ss:$8 sps:$4 sm:$0xff]  }
  0x28   :  { %704 = vmatpush1.bf16.msra.mxu0 %v1232_v26  ;;  %764 = vmatprep.mubr.bf16.mxu1 %v83_v2  ;;  %v57_v24 = vcombine.high %v37_v22, %v37_v22  ;;  %v1460_v25 = vrot.slane %v37_v22, %v1449_v48  ;;  %v1308_v36 = vld [vmem:[#allocation2 + $0x224] ss:$8 sps:$4 sm:$0xff]   ;;  %v1306_v37 = vld [vmem:[#allocation2 + $0x220] ss:$8 sps:$4 sm:$0xff]   ;;  %v1327_v52 = vld [vmem:[#allocation2 + $0x2b0] ss:$8 sps:$4 sm:$0xff]  }
  0x29   :  { %705 = vmatprep.subr.bf16.mxu0 %v1236_v27  ;;  %745 = vmatpush1.bf16.msra.mxu1 %v1235_v28  ;;  %v1297_v28 = vld [vmem:[#allocation2 + $0x250] ss:$8 sps:$4 sm:$0xff]   ;;  %v1330_v54 = vld [vmem:[#allocation2 + $0x2a0] ss:$8 sps:$4 sm:$0xff]   ;;  %v1335_v55 = vld [vmem:[#allocation2 + $0x294] ss:$8 sps:$4 sm:$0xff]  }
  0x2a   :  { %746 = vmatprep.subr.bf16.mxu1 %v1239_v29  ;;  %v71_v26 = vrot.slane %v57_v24, %v1449_v48  ;;  %v72_v27 = vcombine.high %v1460_v25, %v1460_v25  ;;  %v1411_v29 = vmov 0   ;;  %v1321_v48 = vld [vmem:[#allocation2 + $0x2d0] ss:$8 sps:$4 sm:$0xff]   ;;  %v1339_v58 = vld [vmem:[#allocation2 + $0x280] ss:$8 sps:$4 sm:$0xff]   ;;  %v84_v59 = vpack.c.bf16 %v1460_v25, %v1460_v25  ;;  %s1041_s10 = sshll.u32 %s1412_s9, 4  ;;  %s1042_s10 = int_to_ptr.vmem [resolvable:$true] %s1041_s10 }
  0x2b   :  { %v1345_v62 = vld [vmem:[%s1530_s3 + $0x70] sm:$0xff]   ;;  %v1349_v2 = vld [vmem:[%s1530_s3 + $0x60] sm:$0xff]   ;;  %v189_v24 = vsub.s32 0, %v1446_v43  ;;  %s1383_s11 = scalar_lea.vmem %s1042_s10, 32  ;;  %p1388_p6 = scmp.lt.s32.totalorder %s1042_s10, %s1042_s10 }
  0x2c   :  { %706 = vmatpush1.bf16.msra.mxu0 %v1238_v30  ;;  %v1302_v30 = vld [vmem:[#allocation2 + $0x244] ss:$8 sps:$4 sm:$0xff]   ;;  %v1346_v63 = vld [vmem:[%s1530_s3 + $0x30] sm:$0xff]   ;;  %v185_v25 = vld [vmem:[%s1529_s2] sm:$0x3]  ;;  %p1384_p5 = scmp.ne.s32.totalorder %s1042_s10, %s1383_s11  ;;  %p1389_p7 = scmp.lt.s32.totalorder %s1383_s11, %s1383_s11 }
  0x2d   :  { %707 = vmatprep.subr.bf16.mxu0 %v1242_v31  ;;  %747 = vmatpush1.bf16.msra.mxu1 %v1241_v32  ;;  %v85_v31 = vpack.c.bf16 %v72_v27, %v72_v27  ;;  %v86_v32 = vpack.c.bf16 %v71_v26, %v71_v26  ;;  %v193_v26 = vsub.s32 1, %v1446_v43  ;;  %v190_v27 = vrot.slane %v185_v25, %v189_v24 }
  0x2e   :  { %748 = vmatprep.subr.bf16.mxu1 %v1245_v33  ;;  %v1300_v33 = vld [vmem:[#allocation2 + $0x240] ss:$8 sps:$4 sm:$0xff]   ;;  %p1390_p8 = por %p1389_p7, %p1388_p6 }
  0x30   :  { %708 = vmatpush2.bf16.msra.mxu0 %v1244_v34  ;;  %v1305_v34 = vld [vmem:[#allocation2 + $0x234] ss:$8 sps:$4 sm:$0xff]   ;;  %p1391_p9 = pnand %p1390_p8, %p1384_p5 }
  0x31   :  { %709 = vmatprep.subr.bf16.mxu0 %v1248_v38  ;;  %749 = vmatpush2.bf16.msra.mxu1 %v1247_v39  ;;  %v1311_v38 = vld [vmem:[#allocation2 + $0x214] ss:$8 sps:$4 sm:$0xff]   ;;  %v1309_v39 = vld [vmem:[#allocation2 + $0x210] ss:$8 sps:$4 sm:$0xff]  }
  0x32   :  { %750 = vmatprep.subr.bf16.mxu1 %v1251_v40  ;;  %v1314_v40 = vld [vmem:[#allocation2 + $0x204] ss:$8 sps:$4 sm:$0xff]  }
  0x34   :  { %710 = vmatpush2.bf16.msra.mxu0 %v1250_v41  ;;  %v1312_v41 = vld [vmem:[#allocation2 + $0x200] ss:$8 sps:$4 sm:$0xff]  }
  0x35   :  { %711 = vmatprep.subr.bf16.mxu0 %v1254_v44  ;;  %751 = vmatpush2.bf16.msra.mxu1 %v1253_v45  ;;  %v1315_v44 = vld [vmem:[#allocation2 + $0x2f0] ss:$8 sps:$4 sm:$0xff]   ;;  %v1320_v45 = vld [vmem:[#allocation2 + $0x2e4] ss:$8 sps:$4 sm:$0xff]  }
  0x36   :  { %752 = vmatprep.subr.bf16.mxu1 %v1257_v46  ;;  %v1318_v46 = vld [vmem:[#allocation2 + $0x2e0] ss:$8 sps:$4 sm:$0xff]  }
  0x38   :  { %712 = vmatpush2.bf16.msra.mxu0 %v1256_v47  ;;  %v1323_v47 = vld [vmem:[#allocation2 + $0x2d4] ss:$8 sps:$4 sm:$0xff]  }
  0x39   :  { %713 = vmatprep.subr.bf16.mxu0 %v1260_v49  ;;  %753 = vmatpush2.bf16.msra.mxu1 %v1259_v50  ;;  %v1326_v49 = vld [vmem:[#allocation2 + $0x2c4] ss:$8 sps:$4 sm:$0xff]   ;;  %v1324_v50 = vld [vmem:[#allocation2 + $0x2c0] ss:$8 sps:$4 sm:$0xff]  }
  0x3a   :  { %754 = vmatprep.subr.bf16.mxu1 %v1263_v51  ;;  %v1329_v51 = vld [vmem:[#allocation2 + $0x2b4] ss:$8 sps:$4 sm:$0xff]  }
  0x3c   :  { %714 = vmatpush2.bf16.msra.mxu0 %v1262_v53  ;;  %v1332_v53 = vld [vmem:[#allocation2 + $0x2a4] ss:$8 sps:$4 sm:$0xff]  }
  0x3d   :  { %715 = vmatprep.subr.bf16.mxu0 %v1266_v56  ;;  %755 = vmatpush2.bf16.msra.mxu1 %v1265_v57  ;;  %v1333_v56 = vld [vmem:[#allocation2 + $0x290] ss:$8 sps:$4 sm:$0xff]   ;;  %v1341_v57 = vld [vmem:[#allocation2 + $0x284] ss:$8 sps:$4 sm:$0xff]  }
  0x3e   :  { %756 = vmatprep.subr.bf16.mxu1 %v1269_v60  ;;  %v1343_v60 = vld [vmem:[%s1530_s3 + $0x78] sm:$0xff]  }
  0x40   :  { %716 = vmatpush2.bf16.msra.mxu0 %v1268_v61  ;;  %v1344_v61 = vld [vmem:[%s1530_s3 + $0x38] sm:$0xff]  }
  0x41   :  { %717 = vmatprep.subr.bf16.mxu0 %v1272_v0  ;;  %757 = vmatpush2.bf16.msra.mxu1 %v1271_v1  ;;  %v1347_v0 = vld [vmem:[%s1530_s3 + $0x68] sm:$0xff]  }
  0x42   :  { %758 = vmatprep.subr.bf16.mxu1 %v1275_v3  ;;  %v1348_v1 = vld [vmem:[%s1530_s3 + $0x28] sm:$0xff]   ;;  %v1350_v3 = vld [vmem:[%s1530_s3 + $0x20] sm:$0xff]  }
  0x44   :  { %718 = vmatpush2.bf16.msra.mxu0 %v1274_v4  ;;  %v1351_v4 = vld [vmem:[%s1530_s3 + $0x58] sm:$0xff]  }
  0x45   :  { %719 = vmatprep.subr.bf16.mxu0 %v1278_v5  ;;  %759 = vmatpush2.bf16.msra.mxu1 %v1277_v6  ;;  %v1352_v5 = vld [vmem:[%s1530_s3 + $0x18] sm:$0xff]   ;;  %v1353_v6 = vld [vmem:[%s1530_s3 + $0x50] sm:$0xff]  }
  0x46   :  { %760 = vmatprep.subr.bf16.mxu1 %v1281_v7  ;;  %v1354_v7 = vld [vmem:[%s1530_s3 + $0x10] sm:$0xff]  }
  0x48   :  { %720 = vmatpush2.bf16.msra.mxu0 %v1280_v8  ;;  %v1355_v8 = vld [vmem:[%s1530_s3 + $0x48] sm:$0xff]  }
  0x49   :  { %721 = vmatprep.subr.bf16.mxu0 %v1284_v9  ;;  %761 = vmatpush2.bf16.msra.mxu1 %v1283_v10  ;;  %v1356_v9 = vld [vmem:[%s1530_s3 + $0x8] sm:$0xff]   ;;  %v1357_v10 = vld [vmem:[%s1530_s3 + $0x40] sm:$0xff]  }
  0x4a   :  { %762 = vmatprep.subr.bf16.mxu1 %v1287_v11  ;;  %v1358_v11 = vld [vmem:[%s1530_s3] sm:$0xff]  }
  0x4c   :  { %722 = vmatpush2.bf16.msra.mxu0 %v1286_v12 }
  0x4d   :  { %773 = vmatprep.subr.bf16.mxu0 %v1292_v13  ;;  %763 = vmatpush2.bf16.msra.mxu1 %v1289_v14 }
  0x4e   :  { %828 = vmatprep.subr.bf16.mxu1 %v1338_v19 }
  0x4f   :  { %724 = vmatmul.mubr.bf16.vlgmr.msra.gmra.mxu0 %v80_v15 }
  0x50   :  { %774 = vmatpush1.bf16.msra.mxu0 %v1290_v16  ;;  %765 = vmatmul.mubr.bf16.vlgmr.msra.gmra.mxu1 %v82_v18 }
  0x51   :  { %775 = vmatprep.subr.bf16.mxu0 %v1296_v17  ;;  %829 = vmatpush1.bf16.msra.mxu1 %v1336_v21 }
  0x52   :  { %846 = vmatprep.mubr.bf16.mxu1 %v1411_v29  ;;  %805 = vmatprep.mubr.bf16.mxu0 %v85_v31 }
  0x53   :  { %1166 = vmatprep.subr.bf16.mxu1 %v1343_v60 }
  0x54   :  { %776 = vmatpush1.bf16.msra.mxu0 %v1294_v20 }
  0x55   :  { %777 = vmatprep.subr.bf16.mxu0 %v1299_v23 }
  0x58   :  { %778 = vmatpush1.bf16.msra.mxu0 %v1297_v28  ;;  %1148 = vmatmul.mubr.msk.bf16.vlgmr.msra.gmra.mxu1 %vm687_vm0, %v86_v32  ;;  %v194_v28 = vrot.slane %v185_v25, %v193_v26 }
  0x59   :  { %779 = vmatprep.subr.bf16.mxu0 %v1302_v30  ;;  %1167 = vmatpush3.bf16.msra.mxu1 %v1344_v61 }
  0x5a   :  { %1168 = vmatprep.subr.bf16.mxu1 %v1345_v62 }
  0x5c   :  { %780 = vmatpush1.bf16.msra.mxu0 %v1300_v33 }
  0x5d   :  { %781 = vmatprep.subr.bf16.mxu0 %v1305_v34  ;;  %1169 = vmatpush3.bf16.msra.mxu1 %v1346_v63 }
  0x5e   :  { %1170 = vmatprep.subr.bf16.mxu1 %v1347_v0 }
  0x60   :  { %782 = vmatpush1.bf16.msra.mxu0 %v1303_v35 }
  0x61   :  { %783 = vmatprep.subr.bf16.mxu0 %v1308_v36  ;;  %1171 = vmatpush3.bf16.msra.mxu1 %v1348_v1 }
  0x62   :  { %1172 = vmatprep.subr.bf16.mxu1 %v1349_v2 }
  0x64   :  { %784 = vmatpush1.bf16.msra.mxu0 %v1306_v37 }
  0x65   :  { %785 = vmatprep.subr.bf16.mxu0 %v1311_v38  ;;  %1173 = vmatpush3.bf16.msra.mxu1 %v1350_v3 }
  0x66   :  { %1174 = vmatprep.subr.bf16.mxu1 %v1351_v4 }
  0x68   :  { %786 = vmatpush1.bf16.msra.mxu0 %v1309_v39 }
  0x69   :  { %787 = vmatprep.subr.bf16.mxu0 %v1314_v40  ;;  %1175 = vmatpush3.bf16.msra.mxu1 %v1352_v5 }
  0x6a   :  { %1176 = vmatprep.subr.bf16.mxu1 %v1353_v6 }
  0x6c   :  { %788 = vmatpush1.bf16.msra.mxu0 %v1312_v41 }
  0x6d   :  { %789 = vmatprep.subr.bf16.mxu0 %v1317_v42  ;;  %1177 = vmatpush3.bf16.msra.mxu1 %v1354_v7 }
  0x6e   :  { %1178 = vmatprep.subr.bf16.mxu1 %v1355_v8 }
  0x70   :  { %790 = vmatpush2.bf16.msra.mxu0 %v1315_v44 }
  0x71   :  { %791 = vmatprep.subr.bf16.mxu0 %v1320_v45  ;;  %1179 = vmatpush3.bf16.msra.mxu1 %v1356_v9 }
  0x72   :  { %1180 = vmatprep.subr.bf16.mxu1 %v1357_v10 }
  0x74   :  { %792 = vmatpush2.bf16.msra.mxu0 %v1318_v46  ;;  %v1149_v46 = vld [vmem:[%s1531_s4] ss:$0 sm:$0xff] }
  0x75   :  { %793 = vmatprep.subr.bf16.mxu0 %v1323_v47  ;;  %1181 = vmatpush3.bf16.msra.mxu1 %v1358_v11 }
  0x78   :  { %794 = vmatpush2.bf16.msra.mxu0 %v1321_v48 }
  0x79   :  { %795 = vmatprep.subr.bf16.mxu0 %v1326_v49 }
  0x7c   :  { %796 = vmatpush2.bf16.msra.mxu0 %v1324_v50 }
  0x7d   :  { %797 = vmatprep.subr.bf16.mxu0 %v1329_v51 }
  0x80   :  { %798 = vmatpush2.bf16.msra.mxu0 %v1327_v52 }
  0x81   :  { %799 = vmatprep.subr.bf16.mxu0 %v1332_v53 }
  0x84   :  { %800 = vmatpush2.bf16.msra.mxu0 %v1330_v54 }
  0x85   :  { %801 = vmatprep.subr.bf16.mxu0 %v1335_v55 }
  0x88   :  { %802 = vmatpush2.bf16.msra.mxu0 %v1333_v56 }
  0x89   :  { %803 = vmatprep.subr.bf16.mxu0 %v1341_v57 }
  0x8c   :  { %804 = vmatpush2.bf16.msra.mxu0 %v1339_v58 }
  0x8f   :  { %806 = vmatmul.mubr.bf16.vlgmr.msra.gmra.mxu0 %v84_v59 }
 0x10f   :  { %v725_v12 = vpop.f32.mrf.mxu0 }
 0x110   :  { %v766_v14 = vpop.f32.mrf.mxu1  ;;  %v726_v29 = vadd.f32 %v725_v12, %v190_v27 }
 0x111   :  { %v727_v13 = vpop.f32.mrf.mxu0 }
 0x112   :  { %v768_v16 = vpop.f32.mrf.mxu1  ;;  %v728_v30 = vadd.f32 %v727_v13, %v194_v28  ;;  %v767_v31 = vadd.f32 %v766_v14, %v726_v29 }
 0x113   :  { %v729_v15 = vpop.f32.mrf.mxu0 }
 0x114   :  { %v770_v18 = vpop.f32.mrf.mxu1  ;;  %v769_v33 = vadd.f32 %v768_v16, %v728_v30 }
 0x115   :  { %v730_v17 = vpop.f32.mrf.mxu0 }
 0x116   :  { %v771_v19 = vpop.f32.mrf.mxu1 }
 0x118   :  { %v848_v20 = vpop.f32.mrf.mxu1 }
 0x11a   :  { %v850_v21 = vpop.f32.mrf.mxu1 }
 0x11c   :  { %v852_v22 = vpop.f32.mrf.mxu1 }
 0x11e   :  { %v853_v23 = vpop.f32.mrf.mxu1 }
 0x14f   :  { %v807_v32 = vpop.f32.mrf.mxu0 }
 0x150   :  { %v808_v34 = vadd.f32 %v807_v32, %v767_v31 }
 0x151   :  { %v809_v35 = vpop.f32.mrf.mxu0 }
 0x152   :  { %v849_v36 = vadd.f32 %v848_v20, %v808_v34  ;;  %v810_v37 = vadd.f32 %v809_v35, %v769_v33 }
 0x153   :  { %v811_v38 = vpop.f32.mrf.mxu0 }
 0x154   :  { %v851_v39 = vadd.f32 %v850_v21, %v810_v37  ;;  %1359 = vtanh.f32 %v849_v36 }
 0x155   :  { %v812_v40 = vpop.f32.mrf.mxu0 }
 0x156   :  { %1361 = vtanh.f32 %v851_v39 }
 0x161   :  { %v1360_v41 = vpop.eup %1359 }
 0x162   :  { %v857_v43 = vpack.c.bf16 %v1360_v41, %v1360_v41 }
 0x163   :  { %v1362_v42 = vpop.eup %1361 }
 0x164   :  { %v858_v44 = vpack.c.bf16 %v1362_v42, %v1362_v42 }
 0x166   :  { %1026 = vmatprep.mubr.bf16.mxu1 %v858_v44 }
 0x167   :  { %1027 = vmatmul.mubr.bf16.vlgmr.msra.gmra.mxu1 %v857_v43 }
 0x227   :  { %v1182_v45 = vpop.f32.mrf.mxu1 }
 0x229   :  { %v1183_v47 = vpop.f32.mrf.mxu1 }
 0x22a   :  { %v1184_v48 = vadd.f32 %v1183_v47, %v1182_v45 }
 0x22b   :  { %v1185_v49 = vpop.f32.mrf.mxu1 }
 0x22c   :  { %v1029_v50 = vadd.f32 %v1184_v48, %v1149_v46 }
 0x22d   :  { %v1186_v51 = vpop.f32.mrf.mxu1 }
 0x22e   :  { %1034 = vst [vmem:[#allocation5] sm:$0x3] %v1029_v50 }
 0x22f   :  { %1394 = shalt.err (!%p1391_p9)
}
 0x230   :  { %1044 = dma.vmem_to_hbm [thread:$0]  %s1042_s10, 32, %s1532_s5, [#allocation4]  }
 0x231   :  { %1405 = dma.done.wait [#allocation4], 32  }
 0x232   :  { %1406 = vsyncadd [#allocation4], 4294967264 }
 0x233   :  { %1048 = vsyncpa [#allocation3], 1 }
 0x234   :  { %1049 = vsyncpa [#allocation4], 1 }

</bundles_post_ra>
